<compile_context>
chip_gen: v7x
topology: tpu7x:2x2x1
jax: 0.10.0
libtpu: 0.0.40
codegen_flags: <defaults>
</compile_context>

<pallas_src>
import functools

import jax
import jax.numpy as jnp
from jax.experimental import pallas as pl
from jax.experimental.pallas import tpu as pltpu


VMEM_LIMIT = 32 * 1024 * 1024  # safe on v5e/v6e (128 MiB) and v7x (64 MiB physical)


def _round_up(x, m):
    return ((x + m - 1) // m) * m


def _tile(dim, target):
    """Pick (tile, padded_dim): use the full dim when small, else a fixed tile.

    `target` is chosen as a multiple of the (8, 128) layout granularity, so any
    tile that is not the full (possibly padded) extent is properly aligned.
    """
    if dim <= target:
        return dim, dim
    return target, _round_up(dim, target)


# ---------------------------------------------------------------------------
# Kernel 1: tiled linear  y = x @ W + b   (used for the qkv projection)
# ---------------------------------------------------------------------------
def _linear_kernel(x_ref, w_ref, b_ref, o_ref, acc_ref):
    k = pl.program_id(2)

    @pl.when(k == 0)
    def _():
        acc_ref[...] = jnp.zeros_like(acc_ref)

    acc_ref[...] += jnp.dot(
        x_ref[...].astype(jnp.bfloat16),
        w_ref[...].astype(jnp.bfloat16),
        preferred_element_type=jnp.float32,
    )

    @pl.when(k == pl.num_programs(2) - 1)
    def _():
        o_ref[...] = (acc_ref[...] + b_ref[...]).astype(o_ref.dtype)


def pallas_linear(x2d, w, b, *, tm_target=256, tn_target=256, tk_target=512):
    M, K = x2d.shape
    Kw, Nout = w.shape
    assert K == Kw

    tm, Mp = _tile(M, tm_target)
    tk, Kp = _tile(K, tk_target)
    tn, Np = _tile(Nout, tn_target)

    xp = x2d if (Mp == M and Kp == K) else jnp.pad(x2d, ((0, Mp - M), (0, Kp - K)))
    wp = w if (Kp == K and Np == Nout) else jnp.pad(w, ((0, Kp - K), (0, Np - Nout)))
    bp = (b if Np == Nout else jnp.pad(b, ((0, Np - Nout),))).reshape(1, Np)

    out = pl.pallas_call(
        _linear_kernel,
        out_shape=jax.ShapeDtypeStruct((Mp, Np), x2d.dtype),
        grid=(Mp // tm, Np // tn, Kp // tk),
        in_specs=[
            pl.BlockSpec((tm, tk), lambda i, j, k: (i, k)),
            pl.BlockSpec((tk, tn), lambda i, j, k: (k, j)),
            pl.BlockSpec((1, tn), lambda i, j, k: (0, j)),
        ],
        out_specs=pl.BlockSpec((tm, tn), lambda i, j, k: (i, j)),
        scratch_shapes=[pltpu.VMEM((tm, tn), jnp.float32)],
        compiler_params=pltpu.CompilerParams(
            dimension_semantics=("parallel", "parallel", "arbitrary"),
            vmem_limit_bytes=VMEM_LIMIT,
        ),
    )(xp, wp, bp)

    if Mp != M or Np != Nout:
        out = out[:M, :Nout]
    return out


# ---------------------------------------------------------------------------
# Kernel 2: head-batched scaled-dot-product attention with softmax
# ---------------------------------------------------------------------------
def _attn_kernel(q_ref, k_ref, v_ref, ctx_ref, attn_ref, *, scale):
    # refs: q/k/v (Hb, N, hd);  outputs: ctx (Hb, N, hd), attn (Hb, N, N)
    q = (q_ref[...] * scale).astype(jnp.bfloat16)   # scale folded into q (N*hd work)
    k = k_ref[...].astype(jnp.bfloat16)
    v = v_ref[...].astype(jnp.bfloat16)

    # batched contraction over the last dims — no explicit k.T materialized
    s = jnp.einsum("hqd,hkd->hqk", q, k, preferred_element_type=jnp.float32)
    m = jnp.max(s, axis=-1, keepdims=True)
    p = jnp.exp(s - m)
    l = jnp.sum(p, axis=-1, keepdims=True)
    attn = p * pl.reciprocal(l, approx=True)        # EUP, not VALU divide

    attn_ref[...] = attn.astype(attn_ref.dtype)
    ctx = jnp.einsum(
        "hqk,hkd->hqd", attn.astype(jnp.bfloat16), v,
        preferred_element_type=jnp.float32,
    )
    ctx_ref[...] = ctx.astype(ctx_ref.dtype)


def _pick_head_block(H, N, hd):
    """Largest divisor of H whose per-step VMEM footprint stays small."""
    per_head = (3 * N * hd + 2 * N * N) * 4  # q/k/v + scores + attn, f32 bytes
    budget = 8 * 1024 * 1024
    hb = max(1, min(H, budget // max(per_head, 1)))
    while H % hb:
        hb -= 1
    return hb


def pallas_attention_core(qkv, scale, head_block):
    # qkv: (3, B, H, N, hd) — the module's return layout; q/k/v are picked from
    # it with BlockSpec index_maps (no extra copies).
    _, B, H, N, hd = qkv.shape
    Hb = head_block

    def qkv_spec(sel):
        return pl.BlockSpec(
            (None, None, Hb, N, hd), lambda b, h, s=sel: (s, b, h, 0, 0)
        )

    ctx, attn = pl.pallas_call(
        functools.partial(_attn_kernel, scale=scale),
        out_shape=(
            jax.ShapeDtypeStruct((B, H, N, hd), qkv.dtype),  # context (head-major)
            jax.ShapeDtypeStruct((B, H, N, N), qkv.dtype),   # attention map
        ),
        grid=(B, H // Hb),
        in_specs=[qkv_spec(0), qkv_spec(1), qkv_spec(2)],
        out_specs=(
            pl.BlockSpec((None, Hb, N, hd), lambda b, h: (b, h, 0, 0)),
            pl.BlockSpec((None, Hb, N, N), lambda b, h: (b, h, 0, 0)),
        ),
        compiler_params=pltpu.CompilerParams(
            dimension_semantics=("parallel", "parallel"),
            vmem_limit_bytes=VMEM_LIMIT,
        ),
    )(qkv, qkv, qkv)
    return ctx, attn


# ---------------------------------------------------------------------------
# Kernel 3: output projection fused with the head merge.
# Contracts (head, head_dim) == C directly from the head-major context, so the
# (B,H,N,hd) -> (B,N,C) transpose is never materialized in HBM.
# ---------------------------------------------------------------------------
def _proj_kernel(ctx_ref, w_ref, b_ref, o_ref, acc_ref):
    h = pl.program_id(1)

    @pl.when(h == 0)
    def _():
        acc_ref[...] = jnp.zeros_like(acc_ref)

    acc_ref[...] += jnp.dot(
        ctx_ref[...].astype(jnp.bfloat16),
        w_ref[...].astype(jnp.bfloat16),
        preferred_element_type=jnp.float32,
    )

    @pl.when(h == pl.num_programs(1) - 1)
    def _():
        o_ref[...] = (acc_ref[...] + b_ref[...]).astype(o_ref.dtype)


def pallas_proj_from_heads(ctx, w_proj, b_proj):
    B, H, N, hd = ctx.shape
    C = H * hd
    w3 = w_proj.reshape(H, hd, C)   # row h*hd+d of w_proj == (h, d, :) — free reshape
    b2 = b_proj.reshape(1, C)

    return pl.pallas_call(
        _proj_kernel,
        out_shape=jax.ShapeDtypeStruct((B, N, C), ctx.dtype),
        grid=(B, H),  # head axis is the reduction axis
        in_specs=[
            pl.BlockSpec((None, None, N, hd), lambda b, h: (b, h, 0, 0)),
            pl.BlockSpec((None, hd, C), lambda b, h: (h, 0, 0)),
            pl.BlockSpec((1, C), lambda b, h: (0, 0)),
        ],
        out_specs=pl.BlockSpec((None, N, C), lambda b, h: (b, 0, 0)),
        scratch_shapes=[pltpu.VMEM((N, C), jnp.float32)],
        compiler_params=pltpu.CompilerParams(
            dimension_semantics=("parallel", "arbitrary"),
            vmem_limit_bytes=VMEM_LIMIT,
        ),
    )(ctx, w3, b2)


# ---------------------------------------------------------------------------
# Full module forward
# ---------------------------------------------------------------------------
def attention_forward(x, params, num_heads):
    """Reproduces Attention.forward(x) with pad_mask=None, temporal_attn_mask=None.

    Returns (x_out, attn, qkv) exactly like the PyTorch module:
      x_out: (B, N, C), attn: (B, H, N, N), qkv: (3, B, H, N, hd)
    """
    B, N, C = x.shape
    head_dim = C // num_heads
    scale = head_dim ** (-0.5)

    # qkv = self.qkv(x)  (qkv_bias=False -> zero bias), tiled Pallas matmul
    qkv_flat = pallas_linear(x.reshape(B * N, C), params["w_qkv"], params["b_qkv"])

    # (B*N, 3C) -> (3, B, H, N, hd).  This transposed copy is required anyway
    # because the module returns qkv in this layout; the attention kernel reads
    # q/k/v straight out of it via BlockSpec index_maps, so no further copies.
    qkv = qkv_flat.reshape(B, N, 3, num_heads, head_dim).transpose(2, 0, 3, 1, 4)

    Hb = _pick_head_block(num_heads, N, head_dim)
    ctx, attn = pallas_attention_core(qkv, scale, Hb)   # (B,H,N,hd), (B,H,N,N)

    # x = self.proj(attn @ v transposed/reshaped); the reshape/transpose is
    # folded into the proj kernel's head-reduction (no HBM round-trip).
    out = pallas_proj_from_heads(ctx, params["w_proj"], params["b_proj"])

    return out, attn, qkv


# ---------------------------------------------------------------------------
# Pure-JAX reference (f32) and parameter init
# ---------------------------------------------------------------------------
def reference_forward(x, params, num_heads):
    B, N, C = x.shape
    hd = C // num_heads
    scale = hd ** (-0.5)
    qkv = (x.reshape(B * N, C) @ params["w_qkv"] + params["b_qkv"]).reshape(
        B, N, 3, num_heads, hd).transpose(2, 0, 3, 1, 4)
    q, k, v = qkv[0], qkv[1], qkv[2]
    s = jnp.einsum("bhqd,bhkd->bhqk", q, k) * scale
    attn = jax.nn.softmax(s, axis=-1)
    ctx = jnp.einsum("bhqk,bhkd->bhqd", attn, v)
    out = ctx.transpose(0, 2, 1, 3).reshape(B * N, C) @ params["w_proj"] + params["b_proj"]
    return out.reshape(B, N, C), attn, qkv


def init_params(key, dim):
    k1, k2, k3 = jax.random.split(key, 3)
    return {
        # stored as (in, out) == transpose of torch.nn.Linear.weight
        "w_qkv": (jax.random.normal(k1, (dim, 3 * dim), jnp.float32) * 0.02),
        "b_qkv": jnp.zeros((3 * dim,), jnp.float32),  # qkv_bias=False
        "w_proj": (jax.random.normal(k2, (dim, dim), jnp.float32) * 0.02),
        "b_proj": (jax.random.normal(k3, (dim,), jnp.float32) * 0.02),
    }


if __name__ == "__main__":
    B, N, C, H = 2, 8, 32, 8   # head_dim = 4
    key = jax.random.PRNGKey(0)
    kx, kp = jax.random.split(key)
    x = jax.random.normal(kx, (B, N, C), jnp.float32)
    params = init_params(kp, C)

    out, attn, qkv = jax.block_until_ready(attention_forward(x, params, num_heads=H))

    assert out.shape == (B, N, C)
    assert attn.shape == (B, H, N, N)
    assert qkv.shape == (3, B, H, N, C // H)

    # numerical sanity vs. a pure-JAX f32 reference (kernels use bf16 MXU inputs
    # + approx reciprocal, so compare with relative tolerances)
    ref_out, ref_attn, ref_qkv = reference_forward(x, params, H)

    def max_rel(a, b):
        return float(jnp.max(jnp.abs(a - b)) / (jnp.max(jnp.abs(b)) + 1e-6))

    assert max_rel(qkv, ref_qkv) < 2e-2
    assert max_rel(attn, ref_attn) < 2e-2
    assert max_rel(out, ref_out) < 5e-2
    # softmax rows sum to ~1 (approx reciprocal -> slightly looser tolerance)
    assert jnp.allclose(jnp.sum(attn, axis=-1), 1.0, atol=5e-3)

    print("KERNEL_OK")
</pallas_src>

<mosaic_0001>
module attributes {stable_mosaic.version = 11 : i64} {
  func.func @_linear_kernel(%arg0: i32, %arg1: i32, %arg2: i32, %arg3: memref<16x32xf32, #tpu.memory_space<vmem>>, %arg4: memref<32x96xf32, #tpu.memory_space<vmem>>, %arg5: memref<1x96xf32, #tpu.memory_space<vmem>>, %arg6: memref<16x96xf32, #tpu.memory_space<vmem>>, %arg7: memref<16x96xf32, #tpu.memory_space<vmem>>) attributes {dimension_semantics = [#tpu.dimension_semantics<parallel>, #tpu.dimension_semantics<parallel>, #tpu.dimension_semantics<arbitrary>], iteration_bounds = array<i64: 1, 1, 1>, scalar_prefetch = 0 : i64, scratch_operands = 1 : i64, tpu.core_type = #tpu.core_type<tc>, window_params = [{transform_indices = @transform_0, window_bounds = array<i64: 16, 32>}, {transform_indices = @transform_1, window_bounds = array<i64: 32, 96>}, {transform_indices = @transform_2, window_bounds = array<i64: 1, 96>}, {transform_indices = @transform_3, window_bounds = array<i64: 16, 96>}]} {
    %c0_i32 = arith.constant 0 : i32
    %0 = arith.cmpi eq, %arg2, %c0_i32 : i32
    %1 = arith.extui %0 : i1 to i32
    %c0_i32_0 = arith.constant 0 : i32
    %2 = arith.cmpi ne, %1, %c0_i32_0 : i32
    scf.if %2 {
      %cst_10 = arith.constant 0.000000e+00 : f32
      %14 = vector.broadcast %cst_10 : f32 to vector<16x96xf32>
      %c0_11 = arith.constant 0 : index
      %c0_12 = arith.constant 0 : index
      %15 = vector.load %arg7[%c0_11, %c0_12] : memref<16x96xf32, #tpu.memory_space<vmem>>, vector<16x96xf32>
      tpu.vector_store %arg7[%c0_11, %c0_12], %14 {strides = array<i32>} : memref<16x96xf32, #tpu.memory_space<vmem>>, vector<16x96xf32>,
    } else {
    }
    %c0 = arith.constant 0 : index
    %c0_1 = arith.constant 0 : index
    %3 = vector.load %arg7[%c0, %c0_1] : memref<16x96xf32, #tpu.memory_space<vmem>>, vector<16x96xf32>
    %c0_2 = arith.constant 0 : index
    %c0_3 = arith.constant 0 : index
    %4 = vector.load %arg3[%c0_2, %c0_3] : memref<16x32xf32, #tpu.memory_space<vmem>>, vector<16x32xf32>
    %5 = arith.truncf %4 : vector<16x32xf32> to vector<16x32xbf16>
    %c0_4 = arith.constant 0 : index
    %c0_5 = arith.constant 0 : index
    %6 = vector.load %arg4[%c0_4, %c0_5] : memref<32x96xf32, #tpu.memory_space<vmem>>, vector<32x96xf32>
    %7 = arith.truncf %6 : vector<32x96xf32> to vector<32x96xbf16>
    %cst = arith.constant dense<0.000000e+00> : vector<16x96xf32>
    %8 = tpu.matmul %5, %7, %cst {dimension_numbers = #tpu.dot_dimension_numbers<[1], [0], [0], [1], [0, 0, 1, 1], [], []>} : vector<16x32xbf16>, vector<32x96xbf16>, vector<16x96xf32> -> vector<16x96xf32>
    %9 = arith.addf %3, %8 : vector<16x96xf32>
    %c0_6 = arith.constant 0 : index
    %c0_7 = arith.constant 0 : index
    %10 = vector.load %arg7[%c0_6, %c0_7] : memref<16x96xf32, #tpu.memory_space<vmem>>, vector<16x96xf32>
    tpu.vector_store %arg7[%c0_6, %c0_7], %9 {strides = array<i32>} : memref<16x96xf32, #tpu.memory_space<vmem>>, vector<16x96xf32>,
    %c0_i32_8 = arith.constant 0 : i32
    %11 = arith.cmpi eq, %arg2, %c0_i32_8 : i32
    %12 = arith.extui %11 : i1 to i32
    %c0_i32_9 = arith.constant 0 : i32
    %13 = arith.cmpi ne, %12, %c0_i32_9 : i32
    scf.if %13 {
      %c0_10 = arith.constant 0 : index
      %c0_11 = arith.constant 0 : index
      %14 = vector.load %arg7[%c0_10, %c0_11] : memref<16x96xf32, #tpu.memory_space<vmem>>, vector<16x96xf32>
      %c0_12 = arith.constant 0 : index
      %c0_13 = arith.constant 0 : index
      %15 = vector.load %arg5[%c0_12, %c0_13] : memref<1x96xf32, #tpu.memory_space<vmem>>, vector<1x96xf32>
      %16 = vector.broadcast %15 : vector<1x96xf32> to vector<16x96xf32>
      %17 = arith.addf %14, %16 : vector<16x96xf32>
      %c0_14 = arith.constant 0 : index
      %c0_15 = arith.constant 0 : index
      %18 = vector.load %arg6[%c0_14, %c0_15] : memref<16x96xf32, #tpu.memory_space<vmem>>, vector<16x96xf32>
      tpu.vector_store %arg6[%c0_14, %c0_15], %17 {strides = array<i32>} : memref<16x96xf32, #tpu.memory_space<vmem>>, vector<16x96xf32>,
    } else {
    }
    return
  }
  func.func @transform_0(%arg0: i32, %arg1: i32, %arg2: i32) -> (i32, i32) {
    %c0_i32 = arith.constant 0 : i32
    return %arg0, %arg2 : i32, i32
  }
  func.func @transform_1(%arg0: i32, %arg1: i32, %arg2: i32) -> (i32, i32) {
    %c0_i32 = arith.constant 0 : i32
    return %arg2, %arg1 : i32, i32
  }
  func.func @transform_2(%arg0: i32, %arg1: i32, %arg2: i32) -> (i32, i32) {
    %c0_i32 = arith.constant 0 : i32
    %c0_i32_0 = arith.constant 0 : i32
    return %c0_i32, %arg1 : i32, i32
  }
  func.func @transform_3(%arg0: i32, %arg1: i32, %arg2: i32) -> (i32, i32) {
    %c0_i32 = arith.constant 0 : i32
    return %arg0, %arg1 : i32, i32
  }
}

</mosaic_0001>

<bundles_post_ra>
// kernel: tpu_custom_call.1
= control target key start
LH: loop header
LB: loop body
LE: loop exit
PB: predicated region body
PF: predicated region fallthrough
CT: control target
= control target key end

     0   :  { %8 = vsyncpa [#allocation4], 0  ;;  %s319_s0 = inlined_call_operand.hbm [shape: f32[16,32], index: 0, kind: input, shape index: {}]   ;;  %s320_s1 = inlined_call_operand.hbm [shape: f32[32,96], index: 1, kind: input, shape index: {}]   ;;  %s321_s2 = inlined_call_operand.vmem [shape: f32[1,96], index: 2, kind: input, shape index: {}]   ;;  %s322_s3 = inlined_call_operand.hbm [shape: f32[16,96], index: 3, kind: output, shape index: {}]  }
   0x1   :  { %9 = vsyncpa [#allocation7], 0 }
   0x2   :  { %10 = vsyncpa [#allocation5], 0  ;;  %s238_s12 = smov [#allocation3]   ;;  %s166_s16 = scalar_lea.hbm %s319_s0, 256 }
   0x3   :  { %s16_s13 = sshll.u32 %s238_s12, 4  ;;  %p167_p0 = scmp.ne.s32.totalorder %s319_s0, %s166_s16  ;;  %s17_s13 = int_to_ptr.vmem [resolvable:$true] %s16_s13 }
   0x4   :  { %p170_p1 = scmp.lt.u32.totalorder %s166_s16, %s319_s0 }
   0x6   :  { %p172_p2 = pnand %p170_p1, %p167_p0 }
   0x8   :  { %175 = shalt.err (!%p172_p2)
}
   0x9   :  { %s176_s21 = scalar_lea.vmem %s17_s13, 256  ;;  %p181_p4 = scmp.lt.s32.totalorder %s17_s13, %s17_s13 }
   0xa   :  { %p177_p3 = scmp.ne.s32.totalorder %s17_s13, %s176_s21  ;;  %p182_p5 = scmp.lt.s32.totalorder %s176_s21, %s176_s21 }
   0xc   :  { %p183_p6 = por %p182_p5, %p181_p4 }
   0xe   :  { %p184_p7 = pnand %p183_p6, %p177_p3 }
  0x10   :  { %187 = shalt.err (!%p184_p7)
}
  0x11   :  { %s239_s22 = smov 128   ;;  %s240_s23 = smov 8  }
  0x12   :  { %22 = dma.hbm_to_vmem [thread:$0]  %s319_s0, 256, %s17_s13, [#allocation4], %s239_s22, %s239_s22, %s240_s23  }
  0x13   :  { %s241_s26 = smov [#allocation6]   ;;  %s188_s30 = scalar_lea.hbm %s320_s1, 512 }
  0x14   :  { %s28_s27 = sshll.u32 %s241_s26, 4  ;;  %p189_p8 = scmp.ne.s32.totalorder %s320_s1, %s188_s30  ;;  %s29_s27 = int_to_ptr.vmem [resolvable:$true] %s28_s27 }
  0x15   :  { %p192_p9 = scmp.lt.u32.totalorder %s188_s30, %s320_s1 }
  0x17   :  { %p194_p10 = pnand %p192_p9, %p189_p8 }
  0x19   :  { %197 = shalt.err (!%p194_p10)
}
  0x1a   :  { %s198_s8 = scalar_lea.vmem %s29_s27, 512  ;;  %p203_p12 = scmp.lt.s32.totalorder %s29_s27, %s29_s27 }
  0x1b   :  { %p199_p11 = scmp.ne.s32.totalorder %s29_s27, %s198_s8  ;;  %p204_p13 = scmp.lt.s32.totalorder %s198_s8, %s198_s8 }
  0x1d   :  { %p205_p0 = por %p204_p13, %p203_p12 }
  0x1f   :  { %p206_p1 = pnand %p205_p0, %p199_p11 }
  0x21   :  { %209 = shalt.err (!%p206_p1)
}
  0x22   :  { %34 = dma.hbm_to_vmem [thread:$0]  %s320_s1, 512, %s29_s27, [#allocation7], %s239_s22, %s239_s22, %s240_s23  }
  0x23   :  { %232 = dma.done.wait [#allocation4], 256  }
  0x24   :  { %233 = vsyncadd [#allocation4], 4294967040 }
  0x25   :  { %234 = dma.done.wait [#allocation7], 512  }
  0x26   :  { %235 = vsyncadd [#allocation7], 4294966784  ;;  %vm48_vm0 = vcmask 785408   ;;  %v242_v0 = vmov 0.0   ;;  %vm243_vm1 = vmmov 0   ;;  %v56_v1 = vld [vmem:[#allocation6] sm:$0xff] }
  0x27   :  { %49 = vst.msk [vmem:[#allocation2] sm:$0xff] %vm48_vm0, %v242_v0  ;;  %50 = vst.msk [vmem:[#allocation2 + $0x8] sm:$0xff] %vm48_vm0, %v242_v0  ;;  %151 = vmatprep.subr.bf16.mxu0 %v242_v0  ;;  %155 = vmatprep.mubr.msk.bf16.mxu0 %vm243_vm1, %v242_v0  ;;  %v57_v2 = vld [vmem:[#allocation6 + $0x8] sm:$0xff]  ;;  %v58_v3 = vld [vmem:[#allocation6 + $0x10] sm:$0xff]  ;;  %vm62_vm2 = vcmask 261120   ;;  %s244_s11 = smov [#allocation8]  }
  0x28   :  { %v60_v4 = vpack.c.bf16 %v57_v2, %v56_v1  ;;  %v59_v5 = vld [vmem:[#allocation6 + $0x18] sm:$0xff]  ;;  %v53_v7 = vld [vmem:[#allocation3] sm:$0xff]  ;;  %v147_v18 = vld [vmem:[%s321_s2] ss:$0 sm:$0xff]  ;;  %s133_s12 = sshll.u32 %s244_s11, 4  ;;  %s134_s12 = int_to_ptr.vmem [resolvable:$true] %s133_s12 }
  0x29   :  { %v61_v6 = vpack.c.bf16 %v59_v5, %v58_v3  ;;  %v54_v8 = vld [vmem:[#allocation3 + $0x8] sm:$0xff]  ;;  %s210_s13 = scalar_lea.vmem %s134_s12, 256  ;;  %p215_p3 = scmp.lt.s32.totalorder %s134_s12, %s134_s12 }
  0x2a   :  { %152 = vmatpush3.bf16.msra.mxu0 %v60_v4  ;;  %v55_v9 = vpack.c.bf16 %v54_v8, %v53_v7  ;;  %p211_p2 = scmp.ne.s32.totalorder %s134_s12, %s210_s13  ;;  %p216_p4 = scmp.lt.s32.totalorder %s210_s13, %s210_s13 }
  0x2b   :  { %153 = vmatprep.subr.bf16.mxu0 %v242_v0 }
  0x2c   :  { %p217_p5 = por %p216_p4, %p215_p3 }
  0x2e   :  { %154 = vmatpush3.bf16.msra.mxu0 %v61_v6  ;;  %v51_v10 = vld [vmem:[#allocation2] sm:$0xff]  ;;  %v52_v12 = vld [vmem:[#allocation2 + $0x8] sm:$0xff]  ;;  %p218_p6 = pnand %p217_p5, %p211_p2 }
  0x31   :  { %156 = vmatmul.mubr.msk.bf16.vlgmr.msra.gmra.mrb[0].mxu0 %vm62_vm2, %v55_v9 }
 0x104   :  { %v100_v11 = vpop.f32.mrb[0].mxu0 }
 0x105   :  { %v107_v13 = vadd.f32 %v100_v11, %v51_v10  ;;  %v157_v14 = vpop.f32.mrb[1].mxu0 }
 0x106   :  { %v103_v15 = vpop.f32.mrb[2].mxu0 }
 0x107   :  { %110 = vst.msk [vmem:[#allocation2] sm:$0xff] %vm48_vm0, %v107_v13  ;;  %v108_v16 = vadd.f32 %v103_v15, %v52_v12  ;;  %v158_v17 = vpop.f32.mrb[3].mxu0 }
 0x109   :  { %111 = vst.msk [vmem:[#allocation2 + $0x8] sm:$0xff] %vm48_vm0, %v108_v16 }
 0x10e   :  { %v115_v19 = vld [vmem:[#allocation2] sm:$0xff] }
 0x10f   :  { %v124_v20 = vadd.f32 %v147_v18, %v115_v19 }
 0x110   :  { %v116_v21 = vld [vmem:[#allocation2 + $0x8] sm:$0xff] }
 0x111   :  { %v125_v22 = vadd.f32 %v147_v18, %v116_v21  ;;  %126 = vst.msk [vmem:[#allocation8] sm:$0xff] %vm48_vm0, %v124_v20 }
 0x113   :  { %127 = vst.msk [vmem:[#allocation8 + $0x8] sm:$0xff] %vm48_vm0, %v125_v22 }
 0x114   :  { %221 = shalt.err (!%p218_p6)
}
 0x115   :  { %s222_s15 = scalar_lea.hbm %s322_s3, 256 }
 0x116   :  { %p223_p7 = scmp.ne.s32.totalorder %s322_s3, %s222_s15  ;;  %p226_p8 = scmp.lt.u32.totalorder %s222_s15, %s322_s3 }
 0x118   :  { %p228_p9 = pnand %p226_p8, %p223_p7 }
 0x11a   :  { %231 = shalt.err (!%p228_p9)
}
 0x11b   :  { %139 = dma.vmem_to_hbm [thread:$0]  %s134_s12, 256, %s322_s3, [#allocation5], %s239_s22, %s239_s22, %s240_s23  }
 0x11c   :  { %236 = dma.done.wait [#allocation5], 256  }
 0x11d   :  { %237 = vsyncadd [#allocation5], 4294967040 }
 0x11e   :  { %143 = vsyncpa [#allocation4], 1 }
 0x11f   :  { %144 = vsyncpa [#allocation7], 1 }
 0x120   :  { %145 = vsyncpa [#allocation5], 1 }

</bundles_post_ra>
